<compile_context>
chip_gen: v5e
topology: v5e:2x2
jax: 0.10.0
libtpu: 0.0.40
codegen_flags: <defaults>
</compile_context>

<pallas_src>
import jax
import jax.numpy as jnp
from jax.experimental import pallas as pl

FC_DIM = 1024


def decoder_rnn_kernel(
    x_ref,     # (B, E)       bf16   embedded input token
    h_ref,     # (B, H)       f32    previous hidden state (n_layers == 1)
    enc_ref,   # (B, S, H)    bf16   encoder outputs (batch-major layout)
    wih_ref,   # (E, 3H)      bf16   fused GRU input weights  [r | z | n]
    whh_ref,   # (H, 3H)      bf16   fused GRU hidden weights [r | z | n]
    bih_ref,   # (1, 3H)      f32
    bhh_ref,   # (1, 3H)      f32
    wcat_ref,  # (2H, H)      bf16   fused concat-linear weight [rnn_output | context]
    bc_ref,    # (1, H)       f32
    wo_ref,    # (H, FC_DIM)  bf16   output projection (fully resident)
    bo_ref,    # (1, FC_DIM)  f32
    out_ref,   # (B, FC_DIM)  f32    raw logits
    hnew_ref,  # (B, H)       f32    new hidden state
    attn_ref,  # (B, S)       f32    attention weights
):
    H = h_ref.shape[1]

    x = x_ref[...]                                            # bf16 (B, E)
    h = h_ref[...]                                            # f32  (B, H)

    # ---- fused GRU cell (PyTorch gate order r, z, n) ----
    gi = jnp.dot(x, wih_ref[...],
                 preferred_element_type=jnp.float32) + bih_ref[...]          # (B, 3H)
    gh = jnp.dot(h.astype(jnp.bfloat16), whh_ref[...],
                 preferred_element_type=jnp.float32) + bhh_ref[...]          # (B, 3H)

    r = jax.nn.sigmoid(gi[:, 0:H] + gh[:, 0:H])
    z = jax.nn.sigmoid(gi[:, H:2 * H] + gh[:, H:2 * H])
    n = jnp.tanh(gi[:, 2 * H:3 * H] + r * gh[:, 2 * H:3 * H])
    h_new = (1.0 - z) * n + z * h                             # (B, H) f32
    hnew_ref[...] = h_new

    # ---- attention: scores[b, s] = <h_new[b], enc[b, s]>, softmax over S ----
    enc = enc_ref[...]                                        # (B, S, H) bf16
    h_bf = h_new.astype(jnp.bfloat16)
    scores = jnp.sum((h_bf[:, None, :] * enc).astype(jnp.float32), axis=-1)  # (B, S)
    m = jnp.max(scores, axis=-1, keepdims=True)
    e = jnp.exp(scores - m)
    denom = jnp.sum(e, axis=-1, keepdims=True)
    attn = e * pl.reciprocal(denom, approx=True)              # (B, S)
    attn_ref[...] = attn

    # ---- context[b, :] = sum_s attn[b, s] * enc[b, s, :] ----
    context = jnp.sum((attn.astype(jnp.bfloat16)[:, :, None] * enc).astype(jnp.float32),
                      axis=1)                                 # (B, H) f32

    # ---- concat -> Linear(2H -> H) -> tanh (single fused MXU matmul) ----
    cat = jnp.concatenate(
        [h_new.astype(jnp.bfloat16), context.astype(jnp.bfloat16)], axis=1)  # (B, 2H)
    cc = jnp.tanh(
        jnp.dot(cat, wcat_ref[...], preferred_element_type=jnp.float32) + bc_ref[...]
    )

    # ---- output projection (raw logits, as in the PyTorch module) ----
    out_ref[...] = (
        jnp.dot(cc.astype(jnp.bfloat16), wo_ref[...],
                preferred_element_type=jnp.float32)
        + bo_ref[...]
    )


def decoder_rnn_forward(params, input_seq, last_hidden, encoder_outputs):
    """
    input_seq:        (B,)        int32 token ids
    last_hidden:      (1, B, H)   float32 (n_layers == 1)
    encoder_outputs:  (S, B, H)   float32 or bfloat16
    Returns (output (B, FC_DIM), hidden (1, B, H), attn_weights (B, 1, S)),
    matching the PyTorch module's return signature.
    """
    B = input_seq.shape[0]
    S, _, H = encoder_outputs.shape

    # Embedding gather stays in JAX glue (folds into the kernel only once multi-step
    # fusion lands; see TODO at top of file).
    embedded = params["embedding"][input_seq]                        # (B, E) bf16
    h_prev = last_hidden[0]                                          # (B, H) f32
    enc = jnp.transpose(encoder_outputs, (1, 0, 2)).astype(jnp.bfloat16)  # (B, S, H)

    out, h_new, attn_bs = pl.pallas_call(
        decoder_rnn_kernel,
        # No grid: every operand (largest is w_out, 64 KiB bf16) is fully VMEM-resident
        # on v5e/v6e/v7x, so the whole step is a single un-tiled invocation.
        out_shape=(
            jax.ShapeDtypeStruct((B, FC_DIM), jnp.float32),
            jax.ShapeDtypeStruct((B, H), jnp.float32),
            jax.ShapeDtypeStruct((B, S), jnp.float32),
        ),
    )(
        embedded, h_prev, enc,
        params["w_ih"], params["w_hh"], params["b_ih"], params["b_hh"],
        params["w_concat"], params["b_concat"],
        params["w_out"], params["b_out"],
    )

    hidden = h_new[None, :, :]          # (1, B, H)
    attn_weights = attn_bs[:, None, :]  # (B, 1, S) -- pure reshape, no transpose
    return out, hidden, attn_weights


def _xavier_normal(key, shape, fan_in, fan_out, dtype=jnp.float32):
    # nn.init.xavier_normal_: std = sqrt(2 / (fan_in + fan_out))
    std = (2.0 / (fan_in + fan_out)) ** 0.5
    return (std * jax.random.normal(key, shape, dtype=jnp.float32)).astype(dtype)


def init_params(key, hidden_size, output_size, embed_size):
    assert embed_size == hidden_size, "module views embedding(H) output as (1, B, embed_size)"
    H, E, V = hidden_size, embed_size, output_size
    ks = jax.random.split(key, 5)
    bf16 = jnp.bfloat16
    return {
        # "pretrained" embeddings -- deterministic synthetic table, frozen, stored bf16.
        "embedding": jax.random.normal(ks[0], (V, H), dtype=jnp.float32).astype(bf16),
        # Fused GRU weights stored transposed (in_features, 3H); gate order [r | z | n].
        # Xavier fans match PyTorch's (3H, in) weight matrices.
        "w_ih": _xavier_normal(ks[1], (E, 3 * H), fan_in=E, fan_out=3 * H, dtype=bf16),
        "w_hh": _xavier_normal(ks[2], (H, 3 * H), fan_in=H, fan_out=3 * H, dtype=bf16),
        # param_init zero-initialises all biases.
        "b_ih": jnp.zeros((1, 3 * H), jnp.float32),
        "b_hh": jnp.zeros((1, 3 * H), jnp.float32),
        # concat: Linear(2H -> H), weight pre-concatenated along the input axis
        # [rnn_output | context] so the kernel needs a single MXU matmul.
        "w_concat": _xavier_normal(ks[3], (2 * H, H), fan_in=2 * H, fan_out=H, dtype=bf16),
        "b_concat": jnp.zeros((1, H), jnp.float32),
        # out: Linear(H -> FC_DIM)
        "w_out": _xavier_normal(ks[4], (H, FC_DIM), fan_in=H, fan_out=FC_DIM, dtype=bf16),
        "b_out": jnp.zeros((1, FC_DIM), jnp.float32),
    }


def decoder_rnn_reference(params, input_seq, last_hidden, encoder_outputs):
    """Pure-JAX reference (f32 math on the bf16-stored params) for correctness checking."""
    H = last_hidden.shape[-1]
    f32 = jnp.float32
    x = params["embedding"][input_seq].astype(f32)
    h = last_hidden[0].astype(f32)
    enc = encoder_outputs.astype(jnp.bfloat16).astype(f32)   # (S, B, H)

    gi = x @ params["w_ih"].astype(f32) + params["b_ih"]
    gh = h @ params["w_hh"].astype(f32) + params["b_hh"]
    r = jax.nn.sigmoid(gi[:, :H] + gh[:, :H])
    z = jax.nn.sigmoid(gi[:, H:2 * H] + gh[:, H:2 * H])
    n = jnp.tanh(gi[:, 2 * H:] + r * gh[:, 2 * H:])
    h_new = (1.0 - z) * n + z * h

    scores = jnp.einsum("bh,sbh->bs", h_new, enc)
    attn = jax.nn.softmax(scores, axis=1)                    # (B, S)
    context = jnp.einsum("bs,sbh->bh", attn, enc)

    cat = jnp.concatenate([h_new, context], axis=1)          # (B, 2H)
    cc = jnp.tanh(cat @ params["w_concat"].astype(f32) + params["b_concat"])
    out = cc @ params["w_out"].astype(f32) + params["b_out"]
    return out, h_new[None, :, :], attn[:, None, :]


if __name__ == "__main__":
    B, S, H, V = 2, 8, 32, 16          # batch, enc seq len, hidden==embed size, vocab
    key = jax.random.PRNGKey(0)
    kp, k1, k2, k3 = jax.random.split(key, 4)

    params = init_params(kp, hidden_size=H, output_size=V, embed_size=H)

    input_seq = jax.random.randint(k1, (B,), 0, V, dtype=jnp.int32)          # (B,)
    last_hidden = jax.random.normal(k2, (1, B, H), dtype=jnp.float32)        # (1, B, H)
    encoder_outputs = jax.random.normal(k3, (S, B, H), dtype=jnp.float32)    # (S, B, H)

    output, hidden, attn_weights = decoder_rnn_forward(
        params, input_seq, last_hidden, encoder_outputs
    )
    jax.block_until_ready((output, hidden, attn_weights))

    assert output.shape == (B, FC_DIM)
    assert hidden.shape == (1, B, H)
    assert attn_weights.shape == (B, 1, S)

    ref_out, ref_hidden, ref_attn = decoder_rnn_reference(
        params, input_seq, last_hidden, encoder_outputs
    )
    assert jnp.allclose(output, ref_out, rtol=0.0, atol=5e-2)
    assert jnp.allclose(hidden, ref_hidden, rtol=0.0, atol=5e-2)
    assert jnp.allclose(attn_weights, ref_attn, rtol=0.0, atol=5e-2)

    print("KERNEL_OK")
</pallas_src>

<mosaic_0001>
module attributes {stable_mosaic.version = 11 : i64} {
  func.func @decoder_rnn_kernel(%arg0: memref<2x32xbf16, #tpu.memory_space<vmem>>, %arg1: memref<2x32xf32, #tpu.memory_space<vmem>>, %arg2: memref<2x8x32xbf16, #tpu.memory_space<vmem>>, %arg3: memref<32x96xbf16, #tpu.memory_space<vmem>>, %arg4: memref<32x96xbf16, #tpu.memory_space<vmem>>, %arg5: memref<1x96xf32, #tpu.memory_space<vmem>>, %arg6: memref<1x96xf32, #tpu.memory_space<vmem>>, %arg7: memref<64x32xbf16, #tpu.memory_space<vmem>>, %arg8: memref<1x32xf32, #tpu.memory_space<vmem>>, %arg9: memref<32x1024xbf16, #tpu.memory_space<vmem>>, %arg10: memref<1x1024xf32, #tpu.memory_space<vmem>>, %arg11: memref<2x1024xf32, #tpu.memory_space<vmem>>, %arg12: memref<2x32xf32, #tpu.memory_space<vmem>>, %arg13: memref<2x8xf32, #tpu.memory_space<vmem>>) attributes {dimension_semantics = [], scalar_prefetch = 0 : i64, scratch_operands = 0 : i64, tpu.core_type = #tpu.core_type<tc>} {
    %c0 = arith.constant 0 : index
    %c0_0 = arith.constant 0 : index
    %0 = vector.load %arg0[%c0, %c0_0] : memref<2x32xbf16, #tpu.memory_space<vmem>>, vector<2x32xbf16>
    %c0_1 = arith.constant 0 : index
    %c0_2 = arith.constant 0 : index
    %1 = vector.load %arg1[%c0_1, %c0_2] : memref<2x32xf32, #tpu.memory_space<vmem>>, vector<2x32xf32>
    %c0_3 = arith.constant 0 : index
    %c0_4 = arith.constant 0 : index
    %2 = vector.load %arg3[%c0_3, %c0_4] : memref<32x96xbf16, #tpu.memory_space<vmem>>, vector<32x96xbf16>
    %cst = arith.constant dense<0.000000e+00> : vector<2x96xf32>
    %3 = tpu.matmul %0, %2, %cst {dimension_numbers = #tpu.dot_dimension_numbers<[1], [0], [0], [1], [0, 0, 1, 1], [], []>} : vector<2x32xbf16>, vector<32x96xbf16>, vector<2x96xf32> -> vector<2x96xf32>
    %c0_5 = arith.constant 0 : index
    %c0_6 = arith.constant 0 : index
    %4 = vector.load %arg5[%c0_5, %c0_6] : memref<1x96xf32, #tpu.memory_space<vmem>>, vector<1x96xf32>
    %5 = vector.broadcast %4 : vector<1x96xf32> to vector<2x96xf32>
    %6 = arith.addf %3, %5 : vector<2x96xf32>
    %7 = arith.truncf %1 : vector<2x32xf32> to vector<2x32xbf16>
    %c0_7 = arith.constant 0 : index
    %c0_8 = arith.constant 0 : index
    %8 = vector.load %arg4[%c0_7, %c0_8] : memref<32x96xbf16, #tpu.memory_space<vmem>>, vector<32x96xbf16>
    %cst_9 = arith.constant dense<0.000000e+00> : vector<2x96xf32>
    %9 = tpu.matmul %7, %8, %cst_9 {dimension_numbers = #tpu.dot_dimension_numbers<[1], [0], [0], [1], [0, 0, 1, 1], [], []>} : vector<2x32xbf16>, vector<32x96xbf16>, vector<2x96xf32> -> vector<2x96xf32>
    %c0_10 = arith.constant 0 : index
    %c0_11 = arith.constant 0 : index
    %10 = vector.load %arg6[%c0_10, %c0_11] : memref<1x96xf32, #tpu.memory_space<vmem>>, vector<1x96xf32>
    %11 = vector.broadcast %10 : vector<1x96xf32> to vector<2x96xf32>
    %12 = arith.addf %9, %11 : vector<2x96xf32>
    %13 = vector.extract_strided_slice %6 {offsets = [0, 0], sizes = [2, 32], strides = [1, 1]} : vector<2x96xf32> to vector<2x32xf32>
    %14 = vector.extract_strided_slice %12 {offsets = [0, 0], sizes = [2, 32], strides = [1, 1]} : vector<2x96xf32> to vector<2x32xf32>
    %15 = arith.addf %13, %14 : vector<2x32xf32>
    %16 = arith.negf %15 : vector<2x32xf32>
    %17 = math.exp %16 : vector<2x32xf32>
    %cst_12 = arith.constant 1.000000e+00 : f32
    %18 = vector.broadcast %cst_12 : f32 to vector<2x32xf32>
    %19 = arith.addf %18, %17 : vector<2x32xf32>
    %20 = arith.divf %18, %19 : vector<2x32xf32>
    %21 = vector.extract_strided_slice %6 {offsets = [0, 32], sizes = [2, 32], strides = [1, 1]} : vector<2x96xf32> to vector<2x32xf32>
    %22 = vector.extract_strided_slice %12 {offsets = [0, 32], sizes = [2, 32], strides = [1, 1]} : vector<2x96xf32> to vector<2x32xf32>
    %23 = arith.addf %21, %22 : vector<2x32xf32>
    %24 = arith.negf %23 : vector<2x32xf32>
    %25 = math.exp %24 : vector<2x32xf32>
    %cst_13 = arith.constant 1.000000e+00 : f32
    %26 = vector.broadcast %cst_13 : f32 to vector<2x32xf32>
    %27 = arith.addf %26, %25 : vector<2x32xf32>
    %28 = arith.divf %26, %27 : vector<2x32xf32>
    %29 = vector.extract_strided_slice %6 {offsets = [0, 64], sizes = [2, 32], strides = [1, 1]} : vector<2x96xf32> to vector<2x32xf32>
    %30 = vector.extract_strided_slice %12 {offsets = [0, 64], sizes = [2, 32], strides = [1, 1]} : vector<2x96xf32> to vector<2x32xf32>
    %31 = arith.mulf %20, %30 : vector<2x32xf32>
    %32 = arith.addf %29, %31 : vector<2x32xf32>
    %33 = math.tanh %32 : vector<2x32xf32>
    %cst_14 = arith.constant 1.000000e+00 : f32
    %34 = vector.broadcast %cst_14 : f32 to vector<2x32xf32>
    %35 = arith.subf %34, %28 : vector<2x32xf32>
    %36 = arith.mulf %35, %33 : vector<2x32xf32>
    %37 = arith.mulf %28, %1 : vector<2x32xf32>
    %38 = arith.addf %36, %37 : vector<2x32xf32>
    %c0_15 = arith.constant 0 : index
    %c0_16 = arith.constant 0 : index
    %39 = vector.load %arg12[%c0_15, %c0_16] : memref<2x32xf32, #tpu.memory_space<vmem>>, vector<2x32xf32>
    tpu.vector_store %arg12[%c0_15, %c0_16], %38 {strides = array<i32>} : memref<2x32xf32, #tpu.memory_space<vmem>>, vector<2x32xf32>,
    %c0_17 = arith.constant 0 : index
    %c0_18 = arith.constant 0 : index
    %c0_19 = arith.constant 0 : index
    %40 = vector.load %arg2[%c0_17, %c0_18, %c0_19] : memref<2x8x32xbf16, #tpu.memory_space<vmem>>, vector<2x8x32xbf16>
    %41 = arith.truncf %38 : vector<2x32xf32> to vector<2x32xbf16>
    %42 = vector.shape_cast %41 : vector<2x32xbf16> to vector<2x1x32xbf16>
    %43 = vector.broadcast %42 : vector<2x1x32xbf16> to vector<2x8x32xbf16>
    %44 = arith.mulf %43, %40 : vector<2x8x32xbf16>
    %45 = arith.extf %44 : vector<2x8x32xbf16> to vector<2x8x32xf32>
    %cst_20 = arith.constant dense<0.000000e+00> : vector<2x8xf32>
    %46 = vector.multi_reduction <add>, %45, %cst_20 [2] : vector<2x8x32xf32> to vector<2x8xf32>
    %cst_21 = arith.constant dense<0xFF800000> : vector<2xf32>
    %47 = vector.multi_reduction <maximumf>, %46, %cst_21 [1] : vector<2x8xf32> to vector<2xf32>
    %48 = vector.shape_cast %47 : vector<2xf32> to vector<2x1xf32>
    %49 = vector.broadcast %48 : vector<2x1xf32> to vector<2x8xf32>
    %50 = arith.subf %46, %49 : vector<2x8xf32>
    %51 = math.exp %50 : vector<2x8xf32>
    %cst_22 = arith.constant dense<0.000000e+00> : vector<2xf32>
    %52 = vector.multi_reduction <add>, %51, %cst_22 [1] : vector<2x8xf32> to vector<2xf32>
    %53 = vector.shape_cast %52 : vector<2xf32> to vector<2x1xf32>
    %54 = tpu.reciprocal %53 {approx = true} : vector<2x1xf32> -> vector<2x1xf32>
    %55 = vector.broadcast %54 : vector<2x1xf32> to vector<2x8xf32>
    %56 = arith.mulf %51, %55 : vector<2x8xf32>
    %c0_23 = arith.constant 0 : index
    %c0_24 = arith.constant 0 : index
    %57 = vector.load %arg13[%c0_23, %c0_24] : memref<2x8xf32, #tpu.memory_space<vmem>>, vector<2x8xf32>
    tpu.vector_store %arg13[%c0_23, %c0_24], %56 {strides = array<i32>} : memref<2x8xf32, #tpu.memory_space<vmem>>, vector<2x8xf32>,
    %58 = arith.truncf %56 : vector<2x8xf32> to vector<2x8xbf16>
    %59 = vector.shape_cast %58 : vector<2x8xbf16> to vector<2x8x1xbf16>
    %60 = vector.broadcast %59 : vector<2x8x1xbf16> to vector<2x8x32xbf16>
    %61 = arith.mulf %60, %40 : vector<2x8x32xbf16>
    %62 = arith.extf %61 : vector<2x8x32xbf16> to vector<2x8x32xf32>
    %cst_25 = arith.constant dense<0.000000e+00> : vector<2x32xf32>
    %63 = vector.multi_reduction <add>, %62, %cst_25 [1] : vector<2x8x32xf32> to vector<2x32xf32>
    %64 = arith.truncf %38 : vector<2x32xf32> to vector<2x32xbf16>
    %65 = arith.truncf %63 : vector<2x32xf32> to vector<2x32xbf16>
    %66 = tpu.concatenate %64, %65 in 1 : vector<2x32xbf16>, vector<2x32xbf16> -> vector<2x64xbf16>
    %c0_26 = arith.constant 0 : index
    %c0_27 = arith.constant 0 : index
    %67 = vector.load %arg7[%c0_26, %c0_27] : memref<64x32xbf16, #tpu.memory_space<vmem>>, vector<64x32xbf16>
    %cst_28 = arith.constant dense<0.000000e+00> : vector<2x32xf32>
    %68 = tpu.matmul %66, %67, %cst_28 {dimension_numbers = #tpu.dot_dimension_numbers<[1], [0], [0], [1], [0, 0, 1, 1], [], []>} : vector<2x64xbf16>, vector<64x32xbf16>, vector<2x32xf32> -> vector<2x32xf32>
    %c0_29 = arith.constant 0 : index
    %c0_30 = arith.constant 0 : index
    %69 = vector.load %arg8[%c0_29, %c0_30] : memref<1x32xf32, #tpu.memory_space<vmem>>, vector<1x32xf32>
    %70 = vector.broadcast %69 : vector<1x32xf32> to vector<2x32xf32>
    %71 = arith.addf %68, %70 : vector<2x32xf32>
    %72 = math.tanh %71 : vector<2x32xf32>
    %73 = arith.truncf %72 : vector<2x32xf32> to vector<2x32xbf16>
    %c0_31 = arith.constant 0 : index
    %c0_32 = arith.constant 0 : index
    %74 = vector.load %arg9[%c0_31, %c0_32] : memref<32x1024xbf16, #tpu.memory_space<vmem>>, vector<32x1024xbf16>
    %cst_33 = arith.constant dense<0.000000e+00> : vector<2x1024xf32>
    %75 = tpu.matmul %73, %74, %cst_33 {dimension_numbers = #tpu.dot_dimension_numbers<[1], [0], [0], [1], [0, 0, 1, 1], [], []>} : vector<2x32xbf16>, vector<32x1024xbf16>, vector<2x1024xf32> -> vector<2x1024xf32>
    %c0_34 = arith.constant 0 : index
    %c0_35 = arith.constant 0 : index
    %76 = vector.load %arg10[%c0_34, %c0_35] : memref<1x1024xf32, #tpu.memory_space<vmem>>, vector<1x1024xf32>
    %77 = vector.broadcast %76 : vector<1x1024xf32> to vector<2x1024xf32>
    %78 = arith.addf %75, %77 : vector<2x1024xf32>
    %c0_36 = arith.constant 0 : index
    %c0_37 = arith.constant 0 : index
    %79 = vector.load %arg11[%c0_36, %c0_37] : memref<2x1024xf32, #tpu.memory_space<vmem>>, vector<2x1024xf32>
    tpu.vector_store %arg11[%c0_36, %c0_37], %78 {strides = array<i32>} : memref<2x1024xf32, #tpu.memory_space<vmem>>, vector<2x1024xf32>,
    return
  }
}

</mosaic_0001>

<bundles_post_ra>
// kernel: tpu_custom_call.1
= control target key start
LH: loop header
LB: loop body
LE: loop exit
PB: predicated region body
PF: predicated region fallthrough
CT: control target
= control target key end

     0   :  { %19 = vsyncpa [#allocation3], 0  ;;  %s1276_s0 = inlined_call_operand.hbm [shape: bf16[2,32], index: 0, kind: input, shape index: {}]   ;;  %s1277_s1 = inlined_call_operand.hbm [shape: f32[2,32], index: 1, kind: input, shape index: {}]   ;;  %s1278_s2 = inlined_call_operand.vmem [shape: bf16[2,8,32], index: 2, kind: input, shape index: {}]   ;;  %s1279_s3 = inlined_call_operand.vmem [shape: bf16[32,96], index: 3, kind: input, shape index: {}]   ;;  %s1280_s4 = inlined_call_operand.vmem [shape: bf16[32,96], index: 4, kind: input, shape index: {}]   ;;  %s1281_s5 = inlined_call_operand.vmem [shape: f32[1,96], index: 5, kind: input, shape index: {}]   ;;  %s1282_s6 = inlined_call_operand.vmem [shape: f32[1,96], index: 6, kind: input, shape index: {}]   ;;  %s1283_s7 = inlined_call_operand.vmem [shape: bf16[64,32], index: 7, kind: input, shape index: {}]   ;;  %s1284_s8 = inlined_call_operand.vmem [shape: f32[1,32], index: 8, kind: input, shape index: {}]   ;;  %s1285_s9 = inlined_call_operand.hbm [shape: bf16[32,1024], index: 9, kind: input, shape index: {}]   ;;  %s1286_s10 = inlined_call_operand.vmem [shape: f32[1,1024], index: 10, kind: input, shape index: {}]   ;;  %s1287_s11 = inlined_call_operand.hbm [shape: f32[2,1024], index: 11, kind: output, shape index: {0}]   ;;  %s1288_s12 = inlined_call_operand.hbm [shape: f32[2,32], index: 12, kind: output, shape index: {1}]   ;;  %s1289_s13 = inlined_call_operand.hbm [shape: f32[2,8], index: 13, kind: output, shape index: {2}]  }
   0x1   :  { %20 = vsyncpa [#allocation6], 0 }
   0x2   :  { %21 = vsyncpa [#allocation4], 0  ;;  %s39_s27 = sshll.u32 %s1277_s1, 4  ;;  %s40_s27 = int_to_ptr.hbm [resolvable:$true] %s39_s27 }
   0x3   :  { %22 = vsyncpa [#allocation10], 0  ;;  %s1071_s28 = smov [#allocation5]   ;;  %s28_s15 = sshll.u32 %s1276_s0, 4  ;;  %s29_s15 = int_to_ptr.hbm [resolvable:$true] %s28_s15 }
   0x4   :  { %s41_s29 = sshll.u32 %s1071_s28, 4  ;;  %s1072_s16 = smov [#allocation2]   ;;  %s42_s29 = int_to_ptr.vmem [resolvable:$true] %s41_s29 }
   0x5   :  { %44 = dma.hbm_to_vmem [thread:$0]  %s40_s27, 32, %s42_s29, [#allocation6]  }
   0x6   :  { %s30_s17 = sshll.u32 %s1072_s16, 4  ;;  %s63_s20 = sshll.u32 %s1285_s9, 4  ;;  %s31_s17 = int_to_ptr.vmem [resolvable:$true] %s30_s17  ;;  %s64_s20 = int_to_ptr.hbm [resolvable:$true] %s63_s20 }
   0x7   :  { %33 = dma.hbm_to_vmem [thread:$0]  %s29_s15, 16, %s31_s17, [#allocation3]  }
   0x8   :  { %s1073_s1 = smov [#allocation7]   ;;  %s1074_s22 = smov 512  }
   0x9   :  { %s65_s21 = sshll.u32 %s1073_s1, 4  ;;  %s1075_s23 = smov 32   ;;  %s66_s21 = int_to_ptr.vmem [resolvable:$true] %s65_s21 }
   0xa   :  { %71 = dma.hbm_to_vmem [thread:$0]  %s64_s20, 2048, %s66_s21, [#allocation6], %s1074_s22, %s1074_s22, %s1075_s23  }
   0xb   :  { %1063 = dma.done.wait [#allocation3], 16  }
   0xc   :  { %1064 = vsyncadd [#allocation3], 4294967280 }
   0xd   :  { %1065 = dma.done.wait [#allocation6], 2080  }
   0xe   :  { %1066 = vsyncadd [#allocation6], 4294965216  ;;  %v850_v0 = vld [vmem:[%s1279_s3 + $0x8] sm:$0xff]  ;;  %v849_v2 = vld [vmem:[%s1279_s3] sm:$0xff]  ;;  %vm109_vm0 = vcmask 261120   ;;  %s1076_s3 = smov 64  }
   0xf   :  { %v852_v1 = vld [vmem:[%s1280_s4 + $0x8] sm:$0xff]  ;;  %v851_v3 = vld [vmem:[%s1280_s4] sm:$0xff]  ;;  %119 = vmatpush.bf16.msra.mxu0 %v850_v0  ;;  %s1077_s16 = smov 96   ;;  %vm217_vm5 = vcmask 1040384   ;;  %vm274_vm6 = vcmask 1041409   ;;  %vm277_vm7 = vcmask 58368  }
  0x10   :  { %156 = vmatpush.bf16.msra.mxu1 %v852_v1  ;;  %v88_v4 = vld [vmem:[#allocation5] sm:$0x3]  ;;  %v87_v6 = vld [vmem:[#allocation2] sm:$0x1]  ;;  %vm425_vm8 = vcmask 523264   ;;  %vm210_vm9 = vcmask 254976  }
  0x11   :  { %v126_v5 = vpack.c.bf16 %v88_v4, %v88_v4  ;;  %v903_v7 = vld [vmem:[%s1282_s6] ss:$0 sm:$0xff]  ;;  %s709_s24 = sshll.u32 %s1288_s12, 4  ;;  %s1080_s25 = smov [#allocation9]   ;;  %vm678_vm10 = vcmask 1041408   ;;  %vm680_vm11 = vcmask 1045508   ;;  %s710_s24 = int_to_ptr.hbm [resolvable:$true] %s709_s24 }
  0x12   :  { %v902_v13 = vld [vmem:[%s1281_s5] ss:$0 sm:$0xff]  ;;  %s707_s9 = sshll.u32 %s1080_s25, 4  ;;  %s720_s28 = sshll.u32 %s1289_s13, 4  ;;  %vm682_vm12 = vcmask 1043456   ;;  %s708_s9 = int_to_ptr.vmem [resolvable:$true] %s707_s9  ;;  %s721_s28 = int_to_ptr.hbm [resolvable:$true] %s720_s28 }
  0x13   :  { %120 = vmatpush.bf16.msra.mxu0 %v849_v2  ;;  %v1186_v31 = vld [vmem:[%s1278_s2] sm:$0xff]   ;;  %s1081_s29 = smov [#allocation11]   ;;  %s698_s15 = sshll.u32 %s1287_s11, 4  ;;  %s699_s15 = int_to_ptr.hbm [resolvable:$true] %s698_s15 }
  0x14   :  { %157 = vmatpush.bf16.msra.mxu1 %v851_v3  ;;  %v875_v32 = vunpack.c.l.bf16 %v1186_v31  ;;  %v876_v33 = vunpack.c.h.bf16 %v1186_v31  ;;  %v854_v31 = vld [vmem:[%s1283_s7 + $0x8] sm:$0xff]  ;;  %s718_s30 = sshll.u32 %s1081_s29, 4  ;;  %s719_s30 = int_to_ptr.vmem [resolvable:$true] %s718_s30 }
  0x16   :  { %748 = vmatmul.msk.bf16.vlgmr.msra.gmra.mxu0 %vm109_vm0, %v87_v6  ;;  %v889_v34 = vpack.i.bf16 %v876_v33, %v875_v32 }
  0x17   :  { %757 = vmatmul.msk.bf16.vlgmr.msra.gmra.mxu1 %vm109_vm0, %v126_v5  ;;  %v270_v5 = vlaneseq }
  0x18   :  { %890 = vrot.lane.b32.xlu2 %v889_v34, %s1075_s23 }
  0x19   :  { %v1208_v6 = vand.u32 127, %v270_v5 }
  0x72   :  { %v891_v51 = vpop.permute.xlu2 %890 }
  0x73   :  { %v892_v54 = vunpack.i.l.bf16 %v891_v51  ;;  %v893_v57 = vunpack.i.h.bf16 %v891_v51 }
  0x93   :  { %v122_v8 = vpop.f32.mrf.mxu0 }
  0x94   :  { %v159_v9 = vpop.f32.mrf.mxu1  ;;  %v123_v14 = vadd.f32 %v902_v13, %v122_v8  ;;  %v1078_v13 = vmov 0  }
  0x95   :  { %v160_v10 = vadd.f32 %v903_v7, %v159_v9  ;;  %900 = vset.pattern.permute.xlu0 %v1078_v13  ;;  %899 = vset.pattern.permute.xlu2 %v1078_v13 }
  0x96   :  { %901 = vset.pattern.permute.xlu1 %v1078_v13 }
  0x97   :  { %184 = vrot.lane.b32.xlu0 %v160_v10, %s1076_s3  ;;  %v163_v15 = vadd.f32 %v160_v10, %v123_v14 }
  0x99   :  { %v758_v16 = vmul.f32 -1.442695, %v163_v15 }
  0x9b   :  { %v124_v12 = vpop.f32.mrf.mxu0  ;;  %905 = vpow2.f32 %v758_v16 }
  0x9c   :  { %v161_v11 = vpop.f32.mrf.mxu1 }
  0xa1   :  { %v906_v17 = vpop.eup %905 }
  0xa2   :  { %v167_v18 = vadd.f32 1.0, %v906_v17 }
  0xa4   :  { %907 = vrcp.f32 %v167_v18  ;;  %v179_v24 = vand.u32 2147483648, %v167_v18  ;;  %vm173_vm2 = vweird.f32 %v167_v18  ;;  %v177_v25 = vand.u32 2147483647, %v167_v18 }
  0xa6   :  { %v180_v27 = vor.u32 1.1754944e-38, %v179_v24  ;;  %vm178_vm4 = vcmp.eq.f32.partialorder %v177_v25, 8.507059e+37 }
  0xaa   :  { %v908_v19 = vpop.eup %907 }
  0xab   :  { %v169_v20 = vmul.f32 %v908_v19, %v167_v18  ;;  %vm174_vm1 = vweird.f32 %v908_v19 }
  0xac   :  { %vm175_vm3 = vmor %vm173_vm2, %vm174_vm1 }
  0xad   :  { %v170_v21 = vsub.f32 1.0, %v169_v20 }
  0xaf   :  { %v171_v22 = vmul.f32 %v908_v19, %v170_v21 }
  0xb1   :  { %v172_v23 = vadd.f32 %v908_v19, %v171_v22 }
  0xb3   :  { %v176_v26 = vsel %vm175_vm3, %v908_v19, %v172_v23 }
  0xb4   :  { %v181_v29 = vsel %vm178_vm4, %v180_v27, %v176_v26 }
  0xb5   :  { %v194_v39 = vsub.f32 1.0, %v181_v29 }
 0x109   :  { %v185_v28 = vpop.permute.xlu0 %184 }
 0x10a   :  { %v187_v30 = vmul.f32 %v185_v28, %v181_v29 }
 0x10c   :  { %189 = vrot.lane.b32.xlu0 %v187_v30, %s1076_s3 }
 0x17e   :  { %v190_v35 = vpop.permute.xlu0 %189 }
 0x17f   :  { %v192_v36 = vadd.f32 %v190_v35, %v123_v14 }
 0x181   :  { %909 = vtanh.f32 %v192_v36 }
 0x187   :  { %v910_v37 = vpop.eup %909 }
 0x188   :  { %196 = vrot.lane.b32.xlu1 %v910_v37, %s1077_s16 }
 0x190   :  { %201 = vrot.lane.b32.xlu1 %v88_v4, %s1075_s23 }
 0x1fa   :  { %v197_v38 = vpop.permute.xlu1 %196 }
 0x1fb   :  { %v199_v41 = vmul.f32 %v197_v38, %v194_v39 }
 0x202   :  { %v202_v40 = vpop.permute.xlu1 %201 }
 0x203   :  { %v204_v42 = vmul.f32 %v202_v40, %v181_v29 }
 0x205   :  { %v1197_v43 = vadd.f32 %v204_v42, %v199_v41  ;;  %v1079_v42 = vmov 839922192  }
 0x207   :  { %v1201_v44 = vpack.c.bf16 %v1197_v43, %v1197_v43 }
 0x209   :  { %v216_v45 = vrot.slane %v1201_v44, 3  ;;  %v372_v40 = vunpack.c.l.b16 %v1201_v44 }
 0x20b   :  { %v220_v46 = vsel %vm217_vm5, %v1201_v44, %v216_v45  ;;  %v373_v41 = vpack.c.b16 %v372_v40, %v372_v40  ;;  %v336_v45 = vunpack.c.l.s4 %v1079_v42  ;;  %v779_v40 = vld [vmem:[#allocation7] sm:$0xf]  ;;  %v857_v42 = vld [vmem:[#allocation7 + $0x4] sm:$0xf] }
 0x20c   :  { %v223_v47 = vunpack.i.h.s16 %v220_v46  ;;  %v759_v48 = vpack.i.b16 %v220_v46, %v220_v46 }
 0x20d   :  { %v337_v46 = vunpack.c.0.s8 %v336_v45 }
 0x20e   :  { %v225_v49 = vpack.i.b16 %v223_v47, %v223_v47  ;;  %v226_v50 = vperm.slane %v759_v48, 0 }
 0x210   :  { %v227_v52 = vperm.slane %v225_v49, 0  ;;  %v229_v53 = vpack.i.b16 %v226_v50, %v226_v50 }
 0x212   :  { %v231_v55 = vperm.slane %v229_v53, 0  ;;  %v233_v56 = vpack.i.b16 %v227_v52, %v227_v52 }
 0x214   :  { %v235_v58 = vperm.slane %v233_v56, 0  ;;  %v236_v59 = vunpack.c.l.bf16 %v231_v55 }
 0x216   :  { %v237_v60 = vunpack.c.l.bf16 %v235_v58  ;;  %v248_v61 = vmul.f32 %v892_v54, %v236_v59 }
 0x218   :  { %v249_v62 = vmul.f32 %v893_v57, %v237_v60 }
 0x21a   :  { %v894_v63 = vpack.i.bf16 %v249_v62, %v248_v61 }
 0x21c   :  { %895 = vrot.lane.b32.xlu2 %v894_v63, %s1077_s16 }
 0x276   :  { %v896_v0 = vpop.permute.xlu2 %895 }
 0x277   :  { %v898_v1 = vunpack.i.h.bf16 %v896_v0  ;;  %v897_v2 = vunpack.i.l.bf16 %v896_v0 }
 0x279   :  { %v265_v3 = vsel %vm109_vm0, %v898_v1, 0.0  ;;  %v262_v4 = vsel %vm109_vm0, %v897_v2, 0.0 }
 0x27a   :  { %266 = vadd.xlane.f32.xlu1 %v265_v3  ;;  %263 = vadd.xlane.f32.xlu0 %v262_v4  ;;  %v856_v4 = vld [vmem:[%s1283_s7 + $0x18] sm:$0xff] }
 0x27b   :  { %432 = vmatpush.bf16.msra.mxu2 %v856_v4 }
 0x2ed   :  { %v267_v7 = vpop.xlane.xlu1 %266  ;;  %v264_v8 = vpop.xlane.xlu0 %263 }
 0x2ee   :  { %v273_v9 = vperm.slane %v267_v7, %v1208_v6  ;;  %v272_v10 = vperm.slane %v264_v8, %v1208_v6 }
 0x2f0   :  { %v275_v11 = vsel %vm274_vm6, %v273_v9, %v272_v10 }
 0x2f1   :  { %v278_v12 = vsel %vm277_vm7, %v275_v11, -inf }
 0x2f2   :  { %279 = vmax.xlane.f32.xlu2 %v278_v12  ;;  %v853_v12 = vld [vmem:[%s1283_s7] sm:$0xff] }
 0x365   :  { %v280_v14 = vpop.xlane.xlu2 %279 }
 0x366   :  { %v282_v15 = vperm.slane %v280_v14, 0  ;;  %v283_v16 = vperm.slane %v280_v14, 1 }
 0x368   :  { %v286_v17 = vsub.f32 %v264_v8, %v282_v15  ;;  %v287_v18 = vsub.f32 %v267_v7, %v283_v16 }
 0x36a   :  { %v288_v19 = vmul.f32 1.442695, %v286_v17  ;;  %v290_v20 = vmul.f32 1.442695, %v287_v18 }
 0x36c   :  { %911 = vpow2.f32 %v288_v19 }
 0x36d   :  { %913 = vpow2.f32 %v290_v20 }
 0x372   :  { %v912_v21 = vpop.eup %911 }
 0x373   :  { %v914_v22 = vpop.eup %913  ;;  %295 = vperm.xlu2 %899, %v912_v21  }
 0x374   :  { %298 = vperm.xlu0 %900, %v914_v22  }
 0x3cd   :  { %v296_v23 = vpop.permute.xlu2 %295 }
 0x3ce   :  { %v300_v25 = vperm.slane %v296_v23, %v1208_v6 }
 0x3e6   :  { %v299_v24 = vpop.permute.xlu0 %298 }
 0x3e7   :  { %v301_v26 = vperm.slane %v299_v24, %v1208_v6 }
 0x3e9   :  { %v302_v27 = vsel %vm274_vm6, %v301_v26, %v300_v25  ;;  %v811_v26 = vld [vmem:[#allocation7 + $0x40] sm:$0xf] }
 0x3ea   :  { %v304_v28 = vsel %vm277_vm7, %v302_v27, 0.0  ;;  %v869_v27 = vld [vmem:[#allocation7 + $0x5c] sm:$0xf0] }
 0x3eb   :  { %305 = vadd.xlane.f32.xlu1 %v304_v28  ;;  %v865_v28 = vld [vmem:[#allocation7 + $0x44] sm:$0xf] }
 0x45e   :  { %v306_v29 = vpop.xlane.xlu1 %305 }
 0x45f   :  { %915 = vrcp.f32 %v306_v29  ;;  %v812_v29 = vor.u32 %v869_v27, %v811_v26 }
 0x461   :  { %566 = vmatpush.bf16.msra.mxu3 %v812_v29 }
 0x465   :  { %v916_v30 = vpop.eup %915 }
 0x466   :  { %v309_v34 = vperm.slane %v916_v30, 0  ;;  %v310_v35 = vperm.slane %v916_v30, 1  ;;  %v813_v30 = vld [vmem:[#allocation7 + $0x60] sm:$0xf0] }
 0x468   :  { %v314_v36 = vmul.f32 %v914_v22, %v310_v35  ;;  %v313_v37 = vmul.f32 %v912_v21, %v309_v34  ;;  %v819_v34 = vld [vmem:[#allocation7 + $0x48] sm:$0xf] }
 0x469   :  { %v870_v35 = vld [vmem:[#allocation7 + $0x64] sm:$0xf0] }
 0x46a   :  { %321 = vperm.xlu0 %900, %v314_v36   ;;  %v329_v38 = vpack.c.bf16 %v314_v36, %v314_v36  ;;  %v328_v39 = vpack.c.bf16 %v313_v37, %v313_v37  ;;  %v816_v36 = vor.u32 %v865_v28, %v813_v30 }
 0x46c   :  { %341 = vperm.xlu2 %899, %v329_v38   ;;  %332 = vperm.xlu1 %901, %v328_v39   ;;  %v827_v38 = vld [vmem:[#allocation7 + $0x50] sm:$0xf] }
 0x46d   :  { %v871_v39 = vld [vmem:[#allocation7 + $0x6c] sm:$0xf0]  ;;  %579 = vmatpush.bf16.msrb.mxu0 %v816_v36 }
 0x474   :  { %374 = vrot.lane.b32.xlu2 %v373_v41, %s1077_s16  ;;  %v861_v41 = vld [vmem:[#allocation7 + $0x1c] sm:$0xf0] }
 0x475   :  { %v780_v45 = vor.u32 %v861_v41, %v779_v40 }
 0x477   :  { %567 = vmatpush.bf16.msra.mxu3 %v780_v45 }
 0x47c   :  { %318 = vperm.xlu2 %899, %v313_v37   ;;  %v820_v37 = vor.u32 %v870_v35, %v819_v34 }
 0x47e   :  { %592 = vmatpush.bf16.msrb.mxu1 %v820_v37 }
 0x4c6   :  { %v342_v47 = vpop.permute.xlu2 %341 }
 0x4c7   :  { %v347_v48 = vperm.slane %v342_v47, %v337_v46  ;;  %v787_v47 = vld [vmem:[#allocation7 + $0x8] sm:$0xf] }
 0x4c9   :  { %v349_v49 = vunpack.c.l.bf16 %v347_v48  ;;  %v862_v48 = vld [vmem:[#allocation7 + $0x24] sm:$0xf0] }
 0x4cb   :  { %v351_v50 = vmul.f32 %v876_v33, %v349_v49 }
 0x4cd   :  { %v353_v51 = vpack.c.bf16 %v351_v50, %v351_v50  ;;  %v788_v50 = vor.u32 %v862_v48, %v787_v47 }
 0x4ce   :  { %v375_v52 = vpop.permute.xlu2 %374 }
 0x4cf   :  { %v355_v53 = vunpack.c.l.bf16 %v353_v51  ;;  %v795_v51 = vld [vmem:[#allocation7 + $0x10] sm:$0xf]  ;;  %593 = vmatpush.bf16.msrb.mxu1 %v788_v50 }
 0x4d1   :  { %v363_v54 = vsel %vm109_vm0, %v355_v53, 0.0 }
 0x4d2   :  { %v364_v55 = vrot.slane %v363_v54, 4 }
 0x4d4   :  { %v365_v59 = vadd.f32 %v364_v55, %v363_v54  ;;  %v866_v54 = vld [vmem:[#allocation7 + $0x4c] sm:$0xf] }
 0x4d5   :  { %v821_v55 = vld [vmem:[#allocation7 + $0x68] sm:$0xf0] }
 0x4d6   :  { %v319_v44 = vpop.permute.xlu2 %318  ;;  %v366_v63 = vrot.slane %v365_v59, 2 }
 0x4d7   :  { %v323_v57 = vperm.slane %v319_v44, %v1208_v6  ;;  %v858_v44 = vld [vmem:[#allocation7 + $0xc] sm:$0xf] }
 0x4d8   :  { %v367_v2 = vadd.f32 %v366_v63, %v365_v59  ;;  %v829_v59 = vld [vmem:[#allocation7 + $0x70] sm:$0xf0] }
 0x4da   :  { %v368_v8 = vrot.slane %v367_v2, 1 }
 0x4dc   :  { %v322_v56 = vpop.permute.xlu0 %321  ;;  %v369_v10 = vadd.f32 %v368_v8, %v367_v2  ;;  %v803_v2 = vld [vmem:[#allocation7 + $0x18] sm:$0xf] }
 0x4dd   :  { %v324_v58 = vperm.slane %v322_v56, %v1208_v6  ;;  %v855_v6 = vld [vmem:[%s1283_s7 + $0x10] sm:$0xff]  ;;  %v824_v56 = vor.u32 %v866_v54, %v821_v55 }
 0x4de   :  { %v333_v60 = vpop.permute.xlu1 %332  ;;  %433 = vmatpush.bf16.msra.mxu2 %v855_v6  ;;  %v371_v14 = vpack.c.bf16 %v369_v10, %v369_v10  ;;  %v904_v6 = vld [vmem:[%s1284_s8] ss:$0 sm:$0xff] }
 0x4df   :  { %v325_v61 = vsel %vm274_vm6, %v324_v58, %v323_v57  ;;  %v338_v62 = vperm.slane %v333_v60, %v337_v46  ;;  %v781_v46 = vld [vmem:[#allocation7 + $0x20] sm:$0xf0]  ;;  %v789_v57 = vld [vmem:[#allocation7 + $0x28] sm:$0xf0]  ;;  %v867_v58 = vld [vmem:[#allocation7 + $0x54] sm:$0xf]  ;;  %605 = vmatpush.bf16.msrb.mxu3 %v824_v56 }
 0x4e0   :  { %327 = vst.msk [vmem:[#allocation11] sm:$0x3] %vm277_vm7, %v325_v61  ;;  %v379_v17 = vperm.slane %v371_v14, 0  ;;  %v784_v49 = vor.u32 %v857_v42, %v781_v46  ;;  %v832_v60 = vor.u32 %v867_v58, %v829_v59  ;;  %v835_v61 = vld [vmem:[#allocation7 + $0x58] sm:$0xf]  ;;  %v792_v63 = vor.u32 %v858_v44, %v789_v57 }
 0x4e1   :  { %v348_v33 = vunpack.c.l.bf16 %v338_v62  ;;  %v872_v62 = vld [vmem:[#allocation7 + $0x74] sm:$0xf0]  ;;  %v805_v14 = vld [vmem:[#allocation7 + $0x38] sm:$0xf0] }
 0x4e2   :  { %434 = vmatpush.bf16.msra.mxu2 %v854_v31  ;;  %v381_v20 = vunpack.c.l.b16 %v379_v17  ;;  %580 = vmatpush.bf16.msrb.mxu0 %v784_v49  ;;  %v837_v31 = vld [vmem:[#allocation7 + $0x78] sm:$0xf0] }
 0x4e3   :  { %v350_v0 = vmul.f32 %v875_v32, %v348_v33  ;;  %v859_v33 = vld [vmem:[#allocation7 + $0x14] sm:$0xf]  ;;  %606 = vmatpush.bf16.msrb.mxu3 %v792_v63 }
 0x4e5   :  { %v352_v1 = vpack.c.bf16 %v350_v0, %v350_v0  ;;  %v836_v0 = vor.u32 %v872_v62, %v835_v61 }
 0x4e6   :  { %435 = vmatpush.bf16.msra.mxu2 %v853_v12  ;;  %631 = vmatpush.bf16.msra.mxu0 %v832_v60 }
 0x4e7   :  { %v354_v3 = vunpack.c.l.bf16 %v352_v1  ;;  %v797_v1 = vld [vmem:[#allocation7 + $0x30] sm:$0xf0]  ;;  %644 = vmatpush.bf16.msra.mxu1 %v836_v0 }
 0x4e8   :  { %v800_v4 = vor.u32 %v859_v33, %v797_v1 }
 0x4e9   :  { %v356_v5 = vsel %vm109_vm0, %v354_v3, 0.0  ;;  %v864_v3 = vld [vmem:[#allocation7 + $0x34] sm:$0xf0] }
 0x4ea   :  { %v357_v7 = vrot.slane %v356_v5, 4  ;;  %632 = vmatpush.bf16.msra.mxu0 %v800_v4 }
 0x4ec   :  { %v358_v9 = vadd.f32 %v357_v7, %v356_v5  ;;  %v804_v5 = vor.u32 %v864_v3, %v803_v2 }
 0x4ee   :  { %v359_v32 = vrot.slane %v358_v9, 2  ;;  %645 = vmatpush.bf16.msra.mxu1 %v804_v5 }
 0x4f0   :  { %v360_v11 = vadd.f32 %v359_v32, %v358_v9  ;;  %v868_v9 = vld [vmem:[#allocation7 + $0x5c] sm:$0xf] }
 0x4f1   :  { %v840_v12 = vor.u32 %v868_v9, %v837_v31 }
 0x4f2   :  { %v361_v13 = vrot.slane %v360_v11, 1 }
 0x4f4   :  { %v362_v15 = vadd.f32 %v361_v13, %v360_v11  ;;  %v860_v13 = vld [vmem:[#allocation7 + $0x1c] sm:$0xf] }
 0x4f6   :  { %v370_v16 = vpack.c.bf16 %v362_v15, %v362_v15  ;;  %v808_v15 = vor.u32 %v860_v13, %v805_v14 }
 0x4f8   :  { %v378_v18 = vperm.slane %v370_v16, 0 }
 0x4fa   :  { %v380_v19 = vunpack.c.l.b16 %v378_v18 }
 0x4fc   :  { %v382_v21 = vsel %vm274_vm6, %v381_v20, %v380_v19 }
 0x4fd   :  { %v383_v22 = vpack.c.b16 %v382_v21, %v382_v21 }
 0x4ff   :  { %384 = vrot.lane.b32.xlu1 %v383_v22, %s1075_s23  ;;  %v459_v22 = vld [vmem:[%s1286_s10] sm:$0xff]  ;;  %s1082_s10 = smov [#allocation8]  }
 0x500   :  { %v462_v26 = vperm.slane %v459_v22, 1  ;;  %v463_v27 = vperm.slane %v459_v22, 2  ;;  %v461_v29 = vperm.slane %v459_v22, 0  ;;  %v464_v30 = vperm.slane %v459_v22, 3  ;;  %s696_s13 = sshll.u32 %s1082_s10, 4  ;;  %s697_s13 = int_to_ptr.vmem [resolvable:$true] %s696_s13 }
 0x501   :  { %v466_v49 = vperm.slane %v459_v22, 5  ;;  %v467_v50 = vperm.slane %v459_v22, 6 }
 0x507   :  { %207 = vrot.lane.b32.xlu1 %v1197_v43, %s1077_s16  ;;  %v828_v43 = vor.u32 %v871_v39, %v827_v38 }
 0x509   :  { %618 = vmatpush.bf16.msrb.mxu2 %v828_v43 }
 0x571   :  { %v385_v23 = vpop.permute.xlu1 %384 }
 0x572   :  { %v388_v24 = vsel %vm109_vm0, %v375_v52, %v385_v23  ;;  %v863_v52 = vld [vmem:[#allocation7 + $0x2c] sm:$0xf0] }
 0x573   :  { %776 = vmatmul.msk.bf16.vlgmr.msra.gmra.mxu2 %vm425_vm8, %v388_v24  ;;  %v796_v53 = vor.u32 %v863_v52, %v795_v51  ;;  %v468_v52 = vperm.slane %v459_v22, 7 }
 0x575   :  { %619 = vmatpush.bf16.msrb.mxu2 %v796_v53  ;;  %v465_v53 = vperm.slane %v459_v22, 4 }
 0x579   :  { %v208_v25 = vpop.permute.xlu1 %207 }
 0x57a   :  { %211 = vst.msk [vmem:[#allocation9] sm:$0x3] %vm210_vm9, %v208_v25 }
 0x57b   :  { %712 = dma.vmem_to_hbm [thread:$0]  %s708_s9, 32, %s710_s24, [#allocation10]  }
 0x57c   :  { %723 = dma.vmem_to_hbm [thread:$0]  %s719_s30, 32, %s721_s28, [#allocation10]  }
 0x5f6   :  { %v437_v7 = vpop.f32.mrf.mxu2 }
 0x5f7   :  { %v438_v8 = vadd.f32 %v904_v6, %v437_v7 }
 0x5f9   :  { %917 = vtanh.f32 %v438_v8 }
 0x5fe   :  { %v439_v32 = vpop.f32.mrf.mxu2 }
 0x5ff   :  { %v918_v10 = vpop.eup %917 }
 0x600   :  { %v442_v11 = vpack.c.bf16 %v918_v10, %v918_v10 }
 0x602   :  { %841 = vmatmul.msk.bf16.vlgmr.msra.gmra.mxu3 %vm109_vm0, %v442_v11  ;;  %842 = vmatmul.msk.bf16.vlgmr.msrb.gmra.mxu0 %vm109_vm0, %v442_v11 }
 0x603   :  { %843 = vmatmul.msk.bf16.vlgmr.msrb.gmra.mxu1 %vm109_vm0, %v442_v11  ;;  %845 = vmatmul.msk.bf16.vlgmr.msrb.gmra.mxu2 %vm109_vm0, %v442_v11 }
 0x604   :  { %657 = vmatpush.bf16.msra.mxu3 %v840_v12 }
 0x608   :  { %658 = vmatpush.bf16.msra.mxu3 %v808_v15 }
 0x612   :  { %844 = vmatmul.msk.bf16.vlgmr.msrb.gmra.mxu3 %vm109_vm0, %v442_v11  ;;  %846 = vmatmul.msk.bf16.vlgmr.msra.gmra.mxu0 %vm109_vm0, %v442_v11 }
 0x613   :  { %847 = vmatmul.msk.bf16.vlgmr.msra.gmra.mxu1 %vm109_vm0, %v442_v11 }
 0x622   :  { %848 = vmatmul.msk.bf16.vlgmr.msra.gmra.mxu3 %vm109_vm0, %v442_v11 }
 0x67f   :  { %v582_v16 = vpop.f32.mrf.mxu0 }
 0x680   :  { %v595_v17 = vpop.f32.mrf.mxu1  ;;  %v583_v34 = vadd.f32 %v582_v16, %v462_v26 }
 0x681   :  { %v596_v35 = vadd.f32 %v595_v17, %v463_v27 }
 0x682   :  { %v672_v43 = vrot.slane %v583_v34, 6 }
 0x683   :  { %v673_v40 = vrot.slane %v596_v35, 4 }
 0x685   :  { %v569_v18 = vpop.f32.mrf.mxu3 }
 0x686   :  { %v621_v19 = vpop.f32.mrf.mxu2  ;;  %v570_v37 = vadd.f32 %v569_v18, %v461_v29 }
 0x687   :  { %v584_v20 = vpop.f32.mrf.mxu0  ;;  %v622_v57 = vadd.f32 %v621_v19, %v465_v53 }
 0x688   :  { %v597_v21 = vpop.f32.mrf.mxu1  ;;  %v679_v45 = vsel %vm678_vm10, %v570_v37, %v672_v43 }
 0x68d   :  { %v571_v23 = vpop.f32.mrf.mxu3 }
 0x68e   :  { %v623_v24 = vpop.f32.mrf.mxu2 }
 0x68f   :  { %v634_v25 = vpop.f32.mrf.mxu0 }
 0x690   :  { %v647_v28 = vpop.f32.mrf.mxu1  ;;  %v635_v51 = vadd.f32 %v634_v25, %v466_v49 }
 0x691   :  { %v648_v54 = vadd.f32 %v647_v28, %v467_v50 }
 0x692   :  { %v675_v44 = vrot.slane %v635_v51, 6 }
 0x693   :  { %v676_v58 = vrot.slane %v648_v54, 4 }
 0x694   :  { %v684_v60 = vsel %vm678_vm10, %v622_v57, %v675_v44 }
 0x695   :  { %v608_v36 = vpop.f32.mrf.mxu3 }
 0x696   :  { %v609_v38 = vadd.f32 %v608_v36, %v464_v30 }
 0x697   :  { %v636_v39 = vpop.f32.mrf.mxu0 }
 0x698   :  { %v674_v41 = vrot.slane %v609_v38, 2  ;;  %v649_v42 = vpop.f32.mrf.mxu1 }
 0x69a   :  { %v681_v46 = vsel %vm680_vm11, %v673_v40, %v674_v41 }
 0x69b   :  { %v683_v47 = vsel %vm682_vm12, %v679_v45, %v681_v46 }
 0x69c   :  { %689 = vst [vmem:[#allocation8] sm:$0xff] %v683_v47 }
 0x69d   :  { %v610_v48 = vpop.f32.mrf.mxu3 }
 0x6a5   :  { %v660_v55 = vpop.f32.mrf.mxu3 }
 0x6a6   :  { %v661_v56 = vadd.f32 %v660_v55, %v468_v52 }
 0x6a8   :  { %v677_v59 = vrot.slane %v661_v56, 2 }
 0x6aa   :  { %v685_v61 = vsel %vm680_vm11, %v676_v58, %v677_v59 }
 0x6ab   :  { %v686_v62 = vsel %vm682_vm12, %v684_v60, %v685_v61 }
 0x6ac   :  { %690 = vst [vmem:[#allocation8 + $0x8] sm:$0xff] %v686_v62 }
 0x6ad   :  { %v662_v33 = vpop.f32.mrf.mxu3  ;;  %701 = dma.vmem_to_hbm [thread:$0]  %s697_s13, 256, %s699_s15, [#allocation4]  }
 0x6ae   :  { %1067 = dma.done.wait [#allocation4], 256  }
 0x6af   :  { %1068 = vsyncadd [#allocation4], 4294967040 }
 0x6b0   :  { %1069 = dma.done.wait [#allocation10], 64  }
 0x6b1   :  { %1070 = vsyncadd [#allocation10], 4294967232 }
 0x6b2   :  { %736 = vsyncpa [#allocation3], 1 }
 0x6b3   :  { %737 = vsyncpa [#allocation6], 1 }
 0x6b4   :  { %738 = vsyncpa [#allocation4], 1 }
 0x6b5   :  { %739 = vsyncpa [#allocation10], 1 }

</bundles_post_ra>
